<compile_context>
chip_gen: v7x
topology: tpu7x:2x2x1
jax: 0.10.0
libtpu: 0.0.40
codegen_flags: <defaults>
</compile_context>

<pallas_src>
import math
import jax
import jax.numpy as jnp
from jax.experimental import pallas as pl
from jax.experimental.pallas import tpu as pltpu

LANE = 128      # TPU lane width (informational; output is intentionally NOT padded)
SUBLANE = 8     # sublane granularity for the row-tile size


def _round_up(x, m):
    return ((x + m - 1) // m) * m


def _default_vmem_budget():
    """~60% of physical VMEM for the tile working set (headroom for compiler
    scratch): ~38 MiB on v7x (64 MiB), ~77 MiB on v5e/v6e (128 MiB)."""
    cap = 64 << 20
    try:
        cap = int(getattr(pltpu.get_tpu_info(), "vmem_capacity_bytes", cap))
    except Exception:
        pass
    return min(int(cap * 0.6), 96 << 20)


def logreg_kernel(x_ref, w_ref, b_ref, o_ref):
    # x_ref: (TM, ft_in)          streaming row tile of the input
    # w_ref: (ft_in, nb_classes)  VMEM-resident pre-transposed weight
    # b_ref: (1, nb_classes)      VMEM-resident bias row
    # o_ref: (TM, nb_classes)     output tile (true width; masked vst is fine)
    acc = jnp.dot(x_ref[...], w_ref[...], preferred_element_type=jnp.float32)
    o_ref[...] = (acc + b_ref[...].astype(jnp.float32)).astype(o_ref.dtype)


def prepare_logreg_params(weight, bias):
    """One-time parameter prep (do NOT call per forward): transpose to
    [ft_in, nb_classes] and reshape bias to a [1, nb_classes] row.
    weight: [nb_classes, ft_in] (PyTorch nn.Linear layout); bias: [nb_classes]."""
    return weight.T, bias.reshape(1, -1)


def logreg_forward(seq, w_t, b2, *, block_rows=1024, out_dtype=None,
                   vmem_budget_bytes=None):
    """seq: [N, ft_in]; w_t: [ft_in, nb_classes]; b2: [1, nb_classes].
    Returns [N, nb_classes] in out_dtype (default: seq.dtype)."""
    n, ft_in = seq.shape
    ft_in_w, nb_classes = w_t.shape
    assert ft_in_w == ft_in, (ft_in_w, ft_in)
    assert b2.shape == (1, nb_classes)

    if out_dtype is None:
        out_dtype = seq.dtype
    in_itemsize = jnp.dtype(seq.dtype).itemsize
    out_itemsize = jnp.dtype(out_dtype).itemsize
    w_itemsize = jnp.dtype(w_t.dtype).itemsize

    if vmem_budget_bytes is None:
        vmem_budget_bytes = _default_vmem_budget()

    # VMEM working set: single-buffered residents + per-row streaming buffers
    # (3x input tile, 2x output tile).
    fixed_bytes = (ft_in * nb_classes * w_itemsize
                   + nb_classes * jnp.dtype(b2.dtype).itemsize)
    per_row_bytes = 3 * ft_in * in_itemsize + 2 * nb_classes * out_itemsize
    avail = max(vmem_budget_bytes - fixed_bytes, per_row_bytes * SUBLANE)
    # TODO(synk): if ft_in is so large that even an 8-row tile overflows the
    # budget, add a K-tiled "arbitrary" grid axis with an f32 acc scratch.
    tm_cap = max(SUBLANE, (avail // per_row_bytes) // SUBLANE * SUBLANE)

    tm = min(block_rows, tm_cap, _round_up(n, SUBLANE))
    if n > SUBLANE:
        # guarantee >=2 row tiles so "parallel" can shard across v7x's 2 TCs
        tm = min(tm, _round_up(pl.cdiv(n, 2), SUBLANE))
    tm = max(SUBLANE, (tm // SUBLANE) * SUBLANE)   # final multiple-of-8 rounding

    grid = (pl.cdiv(n, tm),)

    vmem_bytes = tm * per_row_bytes + fixed_bytes
    vmem_limit = int(min(100 << 20, max(16 << 20, 2 * vmem_bytes)))

    cost = pl.CostEstimate(
        flops=2 * n * ft_in * nb_classes,
        transcendentals=0,
        bytes_accessed=(n * ft_in * in_itemsize
                        + ft_in * nb_classes * w_itemsize
                        + n * nb_classes * out_itemsize),
    )

    def build(use_buffer_hints):
        def spec(shape, imap, bufs):
            if use_buffer_hints and bufs is not None:
                return pl.BlockSpec(shape, imap, pipeline_mode=pl.Buffered(bufs))
            return pl.BlockSpec(shape, imap)

        return pl.pallas_call(
            logreg_kernel,
            out_shape=jax.ShapeDtypeStruct((n, nb_classes), out_dtype),
            grid_spec=pltpu.PrefetchScalarGridSpec(
                num_scalar_prefetch=0,
                grid=grid,
                in_specs=[
                    spec((tm, ft_in), lambda i: (i, 0), 3),          # streaming rows
                    spec((ft_in, nb_classes), lambda i: (0, 0), 1),  # resident weight
                    spec((1, nb_classes), lambda i: (0, 0), 1),      # resident bias
                ],
                out_specs=pl.BlockSpec((tm, nb_classes), lambda i: (i, 0)),
            ),
            compiler_params=pltpu.CompilerParams(
                dimension_semantics=("parallel",),   # megacore sharding on v7x
                vmem_limit_bytes=vmem_limit,
            ),
            cost_estimate=cost,
        )

    try:
        return build(use_buffer_hints=True)(seq, w_t, b2)
    except Exception:
        # jax version without BlockSpec(pipeline_mode=...) / Buffered(1):
        # fall back to default double-buffered pipelining.
        return build(use_buffer_hints=False)(seq, w_t, b2)


def xavier_uniform(key, out_features, in_features, dtype=jnp.float32):
    # matches torch.nn.init.xavier_uniform_ (gain=1)
    bound = math.sqrt(6.0 / (in_features + out_features))
    return jax.random.uniform(
        key, (out_features, in_features), dtype=dtype, minval=-bound, maxval=bound)


if __name__ == "__main__":
    key = jax.random.PRNGKey(0)
    k_x, k_w = jax.random.split(key)

    N, FT_IN, NB_CLASSES = 8, 32, 16

    seq = jax.random.normal(k_x, (N, FT_IN), dtype=jnp.float32)
    weight = xavier_uniform(k_w, NB_CLASSES, FT_IN)          # [nb_classes, ft_in]
    bias = jnp.zeros((NB_CLASSES,), dtype=jnp.float32)       # bias.fill_(0.0)

    # One-time parameter prep (transpose only), then the forward pass.
    w_t, b2 = prepare_logreg_params(weight, bias)
    out = logreg_forward(seq, w_t, b2)
    jax.block_until_ready(out)

    # correctness check vs plain JAX reference
    ref = seq @ weight.T + bias
    assert out.shape == (N, NB_CLASSES)
    assert jnp.allclose(out, ref, atol=1e-5, rtol=1e-5)

    print("KERNEL_OK")
</pallas_src>

<mosaic_0001>
module attributes {stable_mosaic.version = 11 : i64} {
  func.func @logreg_kernel(%arg0: i32, %arg1: memref<8x32xf32, #tpu.memory_space<vmem>>, %arg2: memref<32x16xf32, #tpu.memory_space<vmem>>, %arg3: memref<1x16xf32, #tpu.memory_space<vmem>>, %arg4: memref<8x16xf32, #tpu.memory_space<vmem>>) attributes {dimension_semantics = [#tpu.dimension_semantics<parallel>], iteration_bounds = array<i64: 1>, scalar_prefetch = 0 : i64, scratch_operands = 0 : i64, tpu.core_type = #tpu.core_type<tc>, window_params = [{transform_indices = @transform_0, window_bounds = array<i64: 8, 32>}, {pipeline_mode = #tpu.pipeline_mode<synchronous>, transform_indices = @transform_1, window_bounds = array<i64: 32, 16>}, {pipeline_mode = #tpu.pipeline_mode<synchronous>, transform_indices = @transform_2, window_bounds = array<i64: 1, 16>}, {transform_indices = @transform_3, window_bounds = array<i64: 8, 16>}]} {
    %c0 = arith.constant 0 : index
    %c0_0 = arith.constant 0 : index
    %0 = vector.load %arg1[%c0, %c0_0] : memref<8x32xf32, #tpu.memory_space<vmem>>, vector<8x32xf32>
    %c0_1 = arith.constant 0 : index
    %c0_2 = arith.constant 0 : index
    %1 = vector.load %arg2[%c0_1, %c0_2] : memref<32x16xf32, #tpu.memory_space<vmem>>, vector<32x16xf32>
    %cst = arith.constant dense<0.000000e+00> : vector<8x16xf32>
    %2 = tpu.matmul %0, %1, %cst {dimension_numbers = #tpu.dot_dimension_numbers<[1], [0], [0], [1], [0, 0, 1, 1], [], []>} : vector<8x32xf32>, vector<32x16xf32>, vector<8x16xf32> -> vector<8x16xf32>
    %c0_3 = arith.constant 0 : index
    %c0_4 = arith.constant 0 : index
    %3 = vector.load %arg3[%c0_3, %c0_4] : memref<1x16xf32, #tpu.memory_space<vmem>>, vector<1x16xf32>
    %4 = vector.broadcast %3 : vector<1x16xf32> to vector<8x16xf32>
    %5 = arith.addf %2, %4 : vector<8x16xf32>
    %c0_5 = arith.constant 0 : index
    %c0_6 = arith.constant 0 : index
    %6 = vector.load %arg4[%c0_5, %c0_6] : memref<8x16xf32, #tpu.memory_space<vmem>>, vector<8x16xf32>
    tpu.vector_store %arg4[%c0_5, %c0_6], %5 {strides = array<i32>} : memref<8x16xf32, #tpu.memory_space<vmem>>, vector<8x16xf32>,
    return
  }
  func.func @transform_0(%arg0: i32) -> (i32, i32) {
    %c0_i32 = arith.constant 0 : i32
    %c0_i32_0 = arith.constant 0 : i32
    return %arg0, %c0_i32 : i32, i32
  }
  func.func @transform_1(%arg0: i32) -> (i32, i32) {
    %c0_i32 = arith.constant 0 : i32
    %c0_i32_0 = arith.constant 0 : i32
    %c0_i32_1 = arith.constant 0 : i32
    return %c0_i32, %c0_i32_0 : i32, i32
  }
  func.func @transform_2(%arg0: i32) -> (i32, i32) {
    %c0_i32 = arith.constant 0 : i32
    %c0_i32_0 = arith.constant 0 : i32
    %c0_i32_1 = arith.constant 0 : i32
    return %c0_i32, %c0_i32_0 : i32, i32
  }
  func.func @transform_3(%arg0: i32) -> (i32, i32) {
    %c0_i32 = arith.constant 0 : i32
    %c0_i32_0 = arith.constant 0 : i32
    return %arg0, %c0_i32 : i32, i32
  }
}

</mosaic_0001>

<bundles_post_ra>
// kernel: tpu_custom_call.1
= control target key start
LH: loop header
LB: loop body
LE: loop exit
PB: predicated region body
PF: predicated region fallthrough
CT: control target
= control target key end

     0   :  { %v169_v3 = vmov 0.0|0.0   ;;  %vm170_vm0 = vmmov 0   ;;  %v171_v6 = vmov 0.0   ;;  %s223_s0 = inlined_call_operand.vmem [shape: f32[8,32], index: 0, kind: input, shape index: {}]   ;;  %s224_s1 = inlined_call_operand.vmem [shape: f32[32,16], index: 1, kind: input, shape index: {}]   ;;  %s225_s2 = inlined_call_operand.vmem [shape: f32[1,16], index: 2, kind: input, shape index: {}]   ;;  %s226_s3 = inlined_call_operand.hbm [shape: f32[8,16], index: 3, kind: output, shape index: {}]  }
   0x1   :  { %v16_v0 = vld [vmem:[%s224_s1] sm:$0xff]  ;;  %v17_v1 = vld [vmem:[%s224_s1 + $0x8] sm:$0xff]  ;;  %v18_v2 = vld [vmem:[%s224_s1 + $0x10] sm:$0xff]  ;;  %135 = vmatprep.subr.bf16.mxu0 %v169_v3  ;;  %132 = vmatprep.mubr.msk.f32.mxu0 %vm170_vm0, %v171_v6 }
   0x2   :  { %v136_v4 = vpack.c.bf16 %v17_v1, %v16_v0  ;;  %v19_v5 = vld [vmem:[%s224_s1 + $0x18] sm:$0xff] }
   0x3   :  { %8 = vsyncpa [#allocation3], 0  ;;  %v139_v7 = vpack.c.bf16 %v19_v5, %v18_v2  ;;  %v15_v8 = vld [vmem:[%s223_s0] sm:$0xff]  ;;  %vm27_vm1 = vcmask 261120   ;;  %s172_s24 = smov [#allocation2]   ;;  %vm101_vm2 = vcmask 130048  }
   0x4   :  { %137 = vmatpush3.bf16.msra.mxu0 %v136_v4  ;;  %v117_v9 = vld [vmem:[%s225_s2] ss:$0 sm:$0xff]  ;;  %s109_s1 = sshll.u32 %s172_s24, 4  ;;  %s110_s1 = int_to_ptr.vmem [resolvable:$true] %s109_s1 }
   0x5   :  { %138 = vmatprep.subr.bf16.mxu0 %v169_v3  ;;  %s145_s25 = scalar_lea.vmem %s110_s1, 128  ;;  %p150_p1 = scmp.lt.s32.totalorder %s110_s1, %s110_s1 }
   0x6   :  { %p146_p0 = scmp.ne.s32.totalorder %s110_s1, %s145_s25  ;;  %p151_p2 = scmp.lt.s32.totalorder %s145_s25, %s145_s25 }
   0x8   :  { %140 = vmatpush3.bf16.msra.mxu0 %v139_v7  ;;  %p152_p3 = por %p151_p2, %p150_p1 }
   0xa   :  { %p153_p4 = pnand %p152_p3, %p146_p0 }
   0xb   :  { %133 = vmatmul.mubr.msk.f32.vlgmr.msra.gmra.mrb[0].mxu0 %vm27_vm1, %v15_v8 }
  0xde   :  { %v97_v10 = vpop.f32.mrb[0].mxu0 }
  0xdf   :  { %v98_v11 = vadd.f32 %v117_v9, %v97_v10  ;;  %v134_v12 = vpop.f32.mrb[1].mxu0 }
  0xe1   :  { %102 = vst.msk [vmem:[#allocation2] sm:$0xff] %vm101_vm2, %v98_v11 }
  0xe2   :  { %156 = shalt.err (!%p153_p4)
}
  0xe3   :  { %s157_s27 = scalar_lea.hbm %s226_s3, 128 }
  0xe4   :  { %p158_p5 = scmp.ne.s32.totalorder %s226_s3, %s157_s27  ;;  %p161_p6 = scmp.lt.u32.totalorder %s157_s27, %s226_s3 }
  0xe6   :  { %p163_p7 = pnand %p161_p6, %p158_p5 }
  0xe8   :  { %166 = shalt.err (!%p163_p7)
}
  0xe9   :  { %112 = dma.vmem_to_hbm [thread:$0]  %s110_s1, 128, %s226_s3, [#allocation3]  }
  0xea   :  { %167 = dma.done.wait [#allocation3], 128  }
  0xeb   :  { %168 = vsyncadd [#allocation3], 4294967168 }
  0xec   :  { %116 = vsyncpa [#allocation3], 1 }

</bundles_post_ra>
